<compile_context>
chip_gen: v7x
topology: tpu7x:2x2x1
jax: 0.10.0
libtpu: 0.0.40
codegen_flags: <defaults>
</compile_context>

<pallas_src>
import functools

import jax
import jax.numpy as jnp
from jax.experimental import pallas as pl
from jax.experimental.pallas import tpu as pltpu


def _uce_kernel(x_ref, y_ref, loss_ref, cnt_ref, acc_loss, acc_cnt, *,
                old_cl, ignore_index):
    b = pl.program_id(0)
    i = pl.program_id(1)

    @pl.when(jnp.logical_and(b == 0, i == 0))
    def _():
        acc_loss[...] = jnp.zeros_like(acc_loss)
        acc_cnt[...] = jnp.zeros_like(acc_cnt)

    x = x_ref[...].astype(jnp.float32)          # (C, TN) logits
    y = y_ref[...]                              # (1, TN) int32 labels

    c_iota = jax.lax.broadcasted_iota(jnp.int32, x.shape, 0)   # (C, TN)

    # Shared exponentials for both logsumexps (single exp pass per pixel).
    m = jnp.max(x, axis=0, keepdims=True)                       # (1, TN)
    e = jnp.exp(x - m)                                           # (C, TN)
    s_all = jnp.sum(e, axis=0, keepdims=True)                    # (1, TN)
    s_old = jnp.sum(jnp.where(c_iota < old_cl, e, 0.0),
                    axis=0, keepdims=True)                       # (1, TN)
    den = m + jnp.log(s_all)                                     # logsumexp(all)
    lse_old = m + jnp.log(s_old)                                 # logsumexp(:old_cl)

    # Gather inputs[label] via aligned one-hot select (only used if label>=old_cl,
    # in which case it is a real channel index, so the one-hot always hits).
    onehot = c_iota == y                                         # (C, TN)
    gathered = jnp.sum(jnp.where(onehot, x, 0.0), axis=0, keepdims=True)

    # label < old_cl  -> picked output channel 0 = lse_old - den
    # label >= old_cl -> picked = inputs[label] - den
    picked = jnp.where(y < old_cl, lse_old, gathered)
    valid = y != ignore_index

    # nll contribution = -(picked - den); masked lanes (ignore / padding)
    # contribute exactly 0 via select (robust even if den/picked were inf/nan).
    acc_loss[...] += jnp.where(valid, den - picked, 0.0)
    acc_cnt[...] += jnp.where(valid, 1.0, 0.0)

    @pl.when(jnp.logical_and(b == pl.num_programs(0) - 1,
                             i == pl.num_programs(1) - 1))
    def _():
        loss_ref[...] = jnp.sum(acc_loss[...], keepdims=True)
        cnt_ref[...] = jnp.sum(acc_cnt[...], keepdims=True)


def unbiased_cross_entropy(inputs, targets, old_cl, *, reduction="mean",
                           ignore_index=255, tile_n=2048):
    """inputs: (B, C, H, W) logits (any float dtype); targets: (B, H, W) ints."""
    b, c, h, w = inputs.shape
    assert targets.shape == (b, h, w)
    assert 0 < old_cl < c
    hw = h * w

    def rup(a, m):
        return (a + m - 1) // m * m

    # Pick a lane tile: large (default 2048) but no bigger than the padded row.
    tile_n = max(128, rup(int(tile_n), 128))
    hw_128 = rup(hw, 128)
    if hw_128 <= tile_n:
        tile_n = hw_128
    hw_pad = rup(hw, tile_n)

    # Free, contiguous reshapes — no HBM transpose, no dtype up-cast.
    x = inputs.reshape(b, c, hw)
    y = targets.reshape(b, 1, hw).astype(jnp.int32)

    if hw_pad != hw:
        # Only pads for awkward spatial sizes; padded labels = ignore_index so
        # they contribute neither to the loss sum nor to the valid count.
        x = jnp.pad(x, ((0, 0), (0, 0), (0, hw_pad - hw)))
        y = jnp.pad(y, ((0, 0), (0, 0), (0, hw_pad - hw)),
                    constant_values=ignore_index)

    grid = (b, hw_pad // tile_n)
    kernel = functools.partial(_uce_kernel, old_cl=old_cl,
                               ignore_index=ignore_index)

    loss_sum, cnt = pl.pallas_call(
        kernel,
        out_shape=(jax.ShapeDtypeStruct((1, 1), jnp.float32),
                   jax.ShapeDtypeStruct((1, 1), jnp.float32)),
        grid_spec=pltpu.PrefetchScalarGridSpec(
            num_scalar_prefetch=0,
            grid=grid,
            in_specs=[
                pl.BlockSpec((None, c, tile_n), lambda bi, i: (bi, 0, i)),
                pl.BlockSpec((None, 1, tile_n), lambda bi, i: (bi, 0, i)),
            ],
            out_specs=(
                pl.BlockSpec((1, 1), lambda bi, i: (0, 0)),
                pl.BlockSpec((1, 1), lambda bi, i: (0, 0)),
            ),
            scratch_shapes=[pltpu.VMEM((1, tile_n), jnp.float32),
                            pltpu.VMEM((1, tile_n), jnp.float32)],
        ),
        compiler_params=pltpu.CompilerParams(
            dimension_semantics=("arbitrary", "arbitrary")),
    )(x, y)

    loss_sum = loss_sum[0, 0]
    cnt = cnt[0, 0]
    if reduction == "mean":
        return loss_sum / cnt
    elif reduction == "sum":
        return loss_sum
    else:
        # TODO(synk): reduction='none' (per-pixel loss map output) not implemented.
        raise NotImplementedError("only 'mean' and 'sum' reductions implemented")


def _reference(inputs, targets, old_cl, ignore_index=255, reduction="mean"):
    # pure-JAX mirror of the PyTorch forward
    c = inputs.shape[1]
    den = jax.nn.logsumexp(inputs, axis=1)                     # (B,H,W)
    lse_old = jax.nn.logsumexp(inputs[:, :old_cl], axis=1)     # (B,H,W)
    labels = jnp.where(targets < old_cl, 0, targets)
    valid = targets != ignore_index
    out_all = inputs - den[:, None]                            # (B,C,H,W)
    gathered = jnp.take_along_axis(
        out_all, jnp.clip(labels, 0, c - 1)[:, None], axis=1)[:, 0]
    picked = jnp.where(labels == 0, lse_old - den, gathered)
    loss = jnp.where(valid, -picked, 0.0)
    if reduction == "mean":
        return jnp.sum(loss) / jnp.sum(valid)
    return jnp.sum(loss)


if __name__ == "__main__":
    key = jax.random.PRNGKey(0)
    k1, k2, k3 = jax.random.split(key, 3)
    B, C, OLD_CL, H, W = 2, 12, 7, 16, 16
    inputs = jax.random.normal(k1, (B, C, H, W), dtype=jnp.float32)
    targets = jax.random.randint(k2, (B, H, W), 0, C)
    ignore_mask = jax.random.uniform(k3, (B, H, W)) < 0.1
    targets = jnp.where(ignore_mask, 255, targets).astype(jnp.int32)

    out = unbiased_cross_entropy(inputs, targets, OLD_CL, reduction="mean")
    out = jax.block_until_ready(out)

    ref = _reference(inputs, targets, OLD_CL)
    assert jnp.allclose(out, ref, rtol=1e-4, atol=1e-5), (out, ref)
    print("KERNEL_OK")
</pallas_src>

<mosaic_0001>
module attributes {stable_mosaic.version = 11 : i64} {
  func.func @_uce_kernel(%arg0: i32, %arg1: i32, %arg2: memref<1x12x256xf32, #tpu.memory_space<vmem>>, %arg3: memref<1x1x256xi32, #tpu.memory_space<vmem>>, %arg4: memref<1x1xf32, #tpu.memory_space<vmem>>, %arg5: memref<1x1xf32, #tpu.memory_space<vmem>>, %arg6: memref<1x256xf32, #tpu.memory_space<vmem>>, %arg7: memref<1x256xf32, #tpu.memory_space<vmem>>) attributes {dimension_semantics = [#tpu.dimension_semantics<arbitrary>, #tpu.dimension_semantics<arbitrary>], iteration_bounds = array<i64: 2, 1>, scalar_prefetch = 0 : i64, scratch_operands = 2 : i64, tpu.core_type = #tpu.core_type<tc>, window_params = [{transform_indices = @transform_0, window_bounds = array<i64: 1, 12, 256>}, {transform_indices = @transform_1, window_bounds = array<i64: 1, 1, 256>}, {pipeline_mode = #tpu.pipeline_mode<synchronous>, transform_indices = @transform_2, window_bounds = array<i64: 1, 1>}, {pipeline_mode = #tpu.pipeline_mode<synchronous>, transform_indices = @transform_3, window_bounds = array<i64: 1, 1>}]} {
    %c0_i32 = arith.constant 0 : i32
    %0 = arith.cmpi eq, %arg0, %c0_i32 : i32
    %c0_i32_0 = arith.constant 0 : i32
    %1 = arith.cmpi eq, %arg1, %c0_i32_0 : i32
    %2 = arith.andi %0, %1 : i1
    %3 = arith.extui %2 : i1 to i32
    %c0_i32_1 = arith.constant 0 : i32
    %4 = arith.cmpi ne, %3, %c0_i32_1 : i32
    scf.if %4 {
      %cst_26 = arith.constant 0.000000e+00 : f32
      %55 = vector.broadcast %cst_26 : f32 to vector<1x256xf32>
      %c0_27 = arith.constant 0 : index
      %c0_28 = arith.constant 0 : index
      %56 = vector.load %arg6[%c0_27, %c0_28] : memref<1x256xf32, #tpu.memory_space<vmem>>, vector<1x256xf32>
      tpu.vector_store %arg6[%c0_27, %c0_28], %55 {strides = array<i32>} : memref<1x256xf32, #tpu.memory_space<vmem>>, vector<1x256xf32>,
      %cst_29 = arith.constant 0.000000e+00 : f32
      %57 = vector.broadcast %cst_29 : f32 to vector<1x256xf32>
      %c0_30 = arith.constant 0 : index
      %c0_31 = arith.constant 0 : index
      %58 = vector.load %arg7[%c0_30, %c0_31] : memref<1x256xf32, #tpu.memory_space<vmem>>, vector<1x256xf32>
      tpu.vector_store %arg7[%c0_30, %c0_31], %57 {strides = array<i32>} : memref<1x256xf32, #tpu.memory_space<vmem>>, vector<1x256xf32>,
    } else {
    }
    %c0 = arith.constant 0 : index
    %c0_2 = arith.constant 0 : index
    %c0_3 = arith.constant 0 : index
    %5 = vector.load %arg2[%c0, %c0_2, %c0_3] : memref<1x12x256xf32, #tpu.memory_space<vmem>>, vector<1x12x256xf32>
    %6 = vector.shape_cast %5 : vector<1x12x256xf32> to vector<12x256xf32>
    %c0_4 = arith.constant 0 : index
    %c0_5 = arith.constant 0 : index
    %c0_6 = arith.constant 0 : index
    %7 = vector.load %arg3[%c0_4, %c0_5, %c0_6] : memref<1x1x256xi32, #tpu.memory_space<vmem>>, vector<1x1x256xi32>
    %8 = vector.shape_cast %7 : vector<1x1x256xi32> to vector<1x256xi32>
    %9 = tpu.iota {dimensions = array<i32: 0>} : vector<12x256xi32>
    %cst = arith.constant dense<0xFF800000> : vector<256xf32>
    %10 = vector.multi_reduction <maximumf>, %6, %cst [0] : vector<12x256xf32> to vector<256xf32>
    %11 = vector.shape_cast %10 : vector<256xf32> to vector<1x256xf32>
    %12 = vector.broadcast %11 : vector<1x256xf32> to vector<12x256xf32>
    %13 = arith.subf %6, %12 : vector<12x256xf32>
    %14 = math.exp %13 : vector<12x256xf32>
    %cst_7 = arith.constant dense<0.000000e+00> : vector<256xf32>
    %15 = vector.multi_reduction <add>, %14, %cst_7 [0] : vector<12x256xf32> to vector<256xf32>
    %16 = vector.shape_cast %15 : vector<256xf32> to vector<1x256xf32>
    %c7_i32 = arith.constant 7 : i32
    %17 = vector.broadcast %c7_i32 : i32 to vector<12x256xi32>
    %18 = arith.cmpi slt, %9, %17 : vector<12x256xi32>
    %cst_8 = arith.constant 0.000000e+00 : f32
    %19 = vector.broadcast %cst_8 : f32 to vector<12x256xf32>
    %20 = arith.select %18, %14, %19 : vector<12x256xi1>, vector<12x256xf32>
    %cst_9 = arith.constant dense<0.000000e+00> : vector<256xf32>
    %21 = vector.multi_reduction <add>, %20, %cst_9 [0] : vector<12x256xf32> to vector<256xf32>
    %22 = vector.shape_cast %21 : vector<256xf32> to vector<1x256xf32>
    %23 = math.log %16 : vector<1x256xf32>
    %24 = arith.addf %11, %23 : vector<1x256xf32>
    %25 = math.log %22 : vector<1x256xf32>
    %26 = arith.addf %11, %25 : vector<1x256xf32>
    %27 = vector.broadcast %8 : vector<1x256xi32> to vector<12x256xi32>
    %28 = arith.cmpi eq, %9, %27 : vector<12x256xi32>
    %cst_10 = arith.constant 0.000000e+00 : f32
    %29 = vector.broadcast %cst_10 : f32 to vector<12x256xf32>
    %30 = arith.select %28, %6, %29 : vector<12x256xi1>, vector<12x256xf32>
    %cst_11 = arith.constant dense<0.000000e+00> : vector<256xf32>
    %31 = vector.multi_reduction <add>, %30, %cst_11 [0] : vector<12x256xf32> to vector<256xf32>
    %32 = vector.shape_cast %31 : vector<256xf32> to vector<1x256xf32>
    %c7_i32_12 = arith.constant 7 : i32
    %33 = vector.broadcast %c7_i32_12 : i32 to vector<1x256xi32>
    %34 = arith.cmpi slt, %8, %33 : vector<1x256xi32>
    %35 = arith.select %34, %26, %32 : vector<1x256xi1>, vector<1x256xf32>
    %c255_i32 = arith.constant 255 : i32
    %36 = vector.broadcast %c255_i32 : i32 to vector<1x256xi32>
    %37 = arith.cmpi ne, %8, %36 : vector<1x256xi32>
    %c0_13 = arith.constant 0 : index
    %c0_14 = arith.constant 0 : index
    %38 = vector.load %arg6[%c0_13, %c0_14] : memref<1x256xf32, #tpu.memory_space<vmem>>, vector<1x256xf32>
    %39 = arith.subf %24, %35 : vector<1x256xf32>
    %cst_15 = arith.constant 0.000000e+00 : f32
    %40 = vector.broadcast %cst_15 : f32 to vector<1x256xf32>
    %41 = arith.select %37, %39, %40 : vector<1x256xi1>, vector<1x256xf32>
    %42 = arith.addf %38, %41 : vector<1x256xf32>
    %c0_16 = arith.constant 0 : index
    %c0_17 = arith.constant 0 : index
    %43 = vector.load %arg6[%c0_16, %c0_17] : memref<1x256xf32, #tpu.memory_space<vmem>>, vector<1x256xf32>
    tpu.vector_store %arg6[%c0_16, %c0_17], %42 {strides = array<i32>} : memref<1x256xf32, #tpu.memory_space<vmem>>, vector<1x256xf32>,
    %c0_18 = arith.constant 0 : index
    %c0_19 = arith.constant 0 : index
    %44 = vector.load %arg7[%c0_18, %c0_19] : memref<1x256xf32, #tpu.memory_space<vmem>>, vector<1x256xf32>
    %cst_20 = arith.constant 1.000000e+00 : f32
    %cst_21 = arith.constant 0.000000e+00 : f32
    %45 = vector.broadcast %cst_20 : f32 to vector<1x256xf32>
    %46 = vector.broadcast %cst_21 : f32 to vector<1x256xf32>
    %47 = arith.select %37, %45, %46 : vector<1x256xi1>, vector<1x256xf32>
    %48 = arith.addf %44, %47 : vector<1x256xf32>
    %c0_22 = arith.constant 0 : index
    %c0_23 = arith.constant 0 : index
    %49 = vector.load %arg7[%c0_22, %c0_23] : memref<1x256xf32, #tpu.memory_space<vmem>>, vector<1x256xf32>
    tpu.vector_store %arg7[%c0_22, %c0_23], %48 {strides = array<i32>} : memref<1x256xf32, #tpu.memory_space<vmem>>, vector<1x256xf32>,
    %c1_i32 = arith.constant 1 : i32
    %50 = arith.cmpi eq, %arg0, %c1_i32 : i32
    %c0_i32_24 = arith.constant 0 : i32
    %51 = arith.cmpi eq, %arg1, %c0_i32_24 : i32
    %52 = arith.andi %50, %51 : i1
    %53 = arith.extui %52 : i1 to i32
    %c0_i32_25 = arith.constant 0 : i32
    %54 = arith.cmpi ne, %53, %c0_i32_25 : i32
    scf.if %54 {
      %c0_26 = arith.constant 0 : index
      %c0_27 = arith.constant 0 : index
      %55 = vector.load %arg6[%c0_26, %c0_27] : memref<1x256xf32, #tpu.memory_space<vmem>>, vector<1x256xf32>
      %56 = vector.shape_cast %55 : vector<1x256xf32> to vector<1x1x256xf32>
      %cst_28 = arith.constant dense<0.000000e+00> : vector<1xf32>
      %57 = vector.multi_reduction <add>, %56, %cst_28 [1, 2] : vector<1x1x256xf32> to vector<1xf32>
      %58 = vector.shape_cast %57 : vector<1xf32> to vector<1x1x1xf32>
      %59 = vector.extract %58[0, 0, 0] : f32 from vector<1x1x1xf32>
      %60 = vector.broadcast %59 : f32 to vector<1x1xf32>
      %c0_29 = arith.constant 0 : index
      %c0_30 = arith.constant 0 : index
      %61 = vector.load %arg4[%c0_29, %c0_30] : memref<1x1xf32, #tpu.memory_space<vmem>>, vector<1x1xf32>
      tpu.vector_store %arg4[%c0_29, %c0_30], %60 {strides = array<i32>} : memref<1x1xf32, #tpu.memory_space<vmem>>, vector<1x1xf32>,
      %c0_31 = arith.constant 0 : index
      %c0_32 = arith.constant 0 : index
      %62 = vector.load %arg7[%c0_31, %c0_32] : memref<1x256xf32, #tpu.memory_space<vmem>>, vector<1x256xf32>
      %63 = vector.shape_cast %62 : vector<1x256xf32> to vector<1x1x256xf32>
      %cst_33 = arith.constant dense<0.000000e+00> : vector<1xf32>
      %64 = vector.multi_reduction <add>, %63, %cst_33 [1, 2] : vector<1x1x256xf32> to vector<1xf32>
      %65 = vector.shape_cast %64 : vector<1xf32> to vector<1x1x1xf32>
      %66 = vector.extract %65[0, 0, 0] : f32 from vector<1x1x1xf32>
      %67 = vector.broadcast %66 : f32 to vector<1x1xf32>
      %c0_34 = arith.constant 0 : index
      %c0_35 = arith.constant 0 : index
      %68 = vector.load %arg5[%c0_34, %c0_35] : memref<1x1xf32, #tpu.memory_space<vmem>>, vector<1x1xf32>
      tpu.vector_store %arg5[%c0_34, %c0_35], %67 {strides = array<i32>} : memref<1x1xf32, #tpu.memory_space<vmem>>, vector<1x1xf32>,
    } else {
    }
    return
  }
  func.func @transform_0(%arg0: i32, %arg1: i32) -> (i32, i32, i32) {
    %c0_i32 = arith.constant 0 : i32
    %c0_i32_0 = arith.constant 0 : i32
    return %arg0, %c0_i32, %arg1 : i32, i32, i32
  }
  func.func @transform_1(%arg0: i32, %arg1: i32) -> (i32, i32, i32) {
    %c0_i32 = arith.constant 0 : i32
    %c0_i32_0 = arith.constant 0 : i32
    return %arg0, %c0_i32, %arg1 : i32, i32, i32
  }
  func.func @transform_2(%arg0: i32, %arg1: i32) -> (i32, i32) {
    %c0_i32 = arith.constant 0 : i32
    %c0_i32_0 = arith.constant 0 : i32
    %c0_i32_1 = arith.constant 0 : i32
    return %c0_i32, %c0_i32_0 : i32, i32
  }
  func.func @transform_3(%arg0: i32, %arg1: i32) -> (i32, i32) {
    %c0_i32 = arith.constant 0 : i32
    %c0_i32_0 = arith.constant 0 : i32
    %c0_i32_1 = arith.constant 0 : i32
    return %c0_i32, %c0_i32_0 : i32, i32
  }
}

</mosaic_0001>

<bundles_post_ra>
// kernel: tpu_custom_call.1
= control target key start
LH: loop header
LB: loop body
LE: loop exit
PB: predicated region body
PF: predicated region fallthrough
CT: control target
= control target key end

     0   :  { %9 = vsyncpa [#allocation5], 0  ;;  %s932_s0 = inlined_call_operand.vmem [shape: f32[2,12,256], index: 0, kind: input, shape index: {}]   ;;  %s933_s1 = inlined_call_operand.vmem [shape: s32[2,1,256], index: 1, kind: input, shape index: {}]   ;;  %s934_s2 = inlined_call_operand.hbm [shape: f32[1,1], index: 2, kind: output, shape index: {0}]   ;;  %s935_s3 = inlined_call_operand.hbm [shape: f32[1,1], index: 3, kind: output, shape index: {1}]  }
   0x1   :  { %10 = vsyncpa [#allocation7], 0  ;;  %s775_s12 = smov 0   ;;  %s777_s13 = smov 0  }
   0x2   :  { %s779_s14 = smov 0  }
   0x3 LB: > { %s587_s15 = sadd.s32 4294967295, %s748_s14   ;;  %s28_s16 = sadd.s32 1, %s744_s13  ;;  %s748_s14 = sphi %s779_s14, %s16_s14   ;;  %s744_s13 = sphi %s777_s13, %s940_s13   ;;  %s740_s12 = sphi %s775_s12, %s939_s12  }
   0x4   : > { %p30_p0 = scmp.ge.s32.totalorder %s28_s16, 2  ;;  %p590_p1 = scmp.ge.s32.totalorder %s748_s14, 1 }
   0x5   : > { %p167_p2 = scmp.lt.s32.totalorder %s748_s14, 3 }
   0x6   : > { %s942_s16 = smov (%p30_p0, %s28_s16), 0 }
   0x7   : > { %p168_p3 = pnand %p590_p1, %p167_p2 }
   0x8   : > { %p199_p4 = scmp.lt.s32.totalorder (!%p168_p3), %s740_s12, 1  ;;  %p217_p5 = scmp.eq.s32.totalorder (!%p168_p3), %s740_s12, 0 }
   0x9   : > { %171 = sbr.rel (%p168_p3) target bundleno = 375 (0x177), region = 28 }
  0x10   : > { %s200_s17 = scalar_select %p199_p4, %s740_s12, 1 }
  0x11   : > { %222 = sbr.rel (!%p217_p5) target bundleno = 24 (0x18), region = 32  ;;  %v223_v0 = vlaneseq (%p217_p5)  ;;  %v750_v1 = vmov (%p217_p5), 0.0  }
  0x12   : > { %s602_s18 = sshll.u32 %s200_s17, 5  ;;  %s593_s19 = sshll.u32 %s200_s17, 1 }
  0x13   : > { %s206_s22 = scalar_lea.vmem %s932_s0, %s602_s18  ;;  %s215_s25 = scalar_lea.vmem %s933_s1, %s593_s19  ;;  %vm225_vm0 = vcmp.lt.s32.totalorder (%p217_p5), %v223_v0, 256 }
  0x14   : > { %227 = vst.msk [vmem:[#allocation2] sm:$0x3] (%p217_p5), %vm225_vm0, %v750_v1  ;;  %228 = vst.msk [vmem:[#allocation3] sm:$0x3] (%p217_p5), %vm225_vm0, %v750_v1 }
  0x18 PF: > { %v229_v2 = vld [vmem:[%s206_s22] sm:$0xff]  ;;  %v230_v3 = vld [vmem:[%s206_s22 + $0x8] sm:$0xff]  ;;  %v231_v4 = vld [vmem:[%s206_s22 + $0x10] sm:$0xf]  ;;  %vm237_vm1 = vcmask 1043456   ;;  %p430_p6 = scmp.eq.s32.totalorder %s740_s12, 1  ;;  %v234_v8 = vlaneseq }
  0x19   : > { %v232_v5 = vld [vmem:[%s206_s22 + $0x18] sm:$0xf]  ;;  %v238_v6 = vsel %vm237_vm1, %v231_v4, -inf  ;;  %v807_v7 = vld [vmem:[%s215_s25] sm:$0x3]  ;;  %v751_v16 = vmov 0.0  }
  0x1a   : > { %v239_v9 = vmax.f32 %v229_v2, %v238_v6  ;;  %v246_v10 = vsel %vm237_vm1, %v232_v5, -inf  ;;  %vm386_vm2 = vcmp.ne.s32.totalorder %v807_v7, 255  ;;  %vm811_vm3 = vcmp.lt.s32.totalorder %v234_v8, 256 }
  0x1b   : > { %v247_v11 = vmax.f32 %v230_v3, %v246_v10  ;;  %v426_v12 = vld [vmem:[#allocation3] sm:$0x3]  ;;  %v427_v17 = vsel %vm386_vm2, 1.0, %v751_v16  ;;  %v817_v18 = vshrl.u32 %v234_v8, 7  ;;  %vm348_vm9 = vcmp.lt.s32.totalorder %v807_v7, 7 }
  0x1c   : > { %v240_v13 = vrot.slane %v239_v9, 4  ;;  %v428_v20 = vadd.f32 %v427_v17, %v426_v12  ;;  %vm447_vm10 = vcmask (%p430_p6), 1040384   ;;  %vm461_vm11 = vcmask (%p430_p6), 0  }
  0x1d   : > { %v248_v14 = vrot.slane %v247_v11, 4  ;;  %v820_v23 = vsub.s32 0, %v817_v18  ;;  %v825_v25 = vsub.s32 1, %v817_v18  ;;  %v236_v28 = vadd.s32 8, %v817_v18 }
  0x1e   : > { %v241_v19 = vmax.f32 %v239_v9, %v240_v13  ;;  %429 = vst.msk [vmem:[#allocation3] sm:$0x3] %vm811_vm3, %v428_v20  ;;  %vm282_vm8 = vcmp.lt.s32.totalorder %v817_v18, 7 }
  0x1f   : > { %v249_v21 = vmax.f32 %v247_v11, %v248_v14  ;;  %v319_v30 = vrot.slane %v807_v7, %v820_v23  ;;  %v323_v32 = vrot.slane %v807_v7, %v825_v25 }
  0x20   : > { %v242_v22 = vrot.slane %v241_v19, 2 }
  0x21   : > { %v250_v24 = vrot.slane %v249_v21, 2  ;;  %vm326_vm4 = vcmp.eq.s32.totalorder %v236_v28, %v319_v30  ;;  %vm327_vm5 = vcmp.eq.s32.totalorder %v236_v28, %v323_v32  ;;  %vm324_vm6 = vcmp.eq.s32.totalorder %v817_v18, %v319_v30 }
  0x22   : > { %v243_v26 = vmax.f32 %v241_v19, %v242_v22  ;;  %v330_v43 = vsel %vm326_vm4, %v231_v4, 0.0  ;;  %vm325_vm7 = vcmp.eq.s32.totalorder %v817_v18, %v323_v32  ;;  %v331_v44 = vsel %vm327_vm5, %v232_v5, 0.0 }
  0x23   : > { %v251_v27 = vmax.f32 %v249_v21, %v250_v24  ;;  %v328_v45 = vsel %vm324_vm6, %v229_v2, 0.0  ;;  %v332_v46 = vsel %vm237_vm1, %v330_v43, 0.0  ;;  %v329_v47 = vsel %vm325_vm7, %v230_v3, 0.0 }
  0x24   : > { %v244_v29 = vrot.slane %v243_v26, 1  ;;  %v340_v48 = vsel %vm237_vm1, %v331_v44, 0.0  ;;  %v333_v49 = vadd.f32 %v332_v46, %v328_v45 }
  0x25   : > { %v252_v31 = vrot.slane %v251_v27, 1  ;;  %v341_v50 = vadd.f32 %v340_v48, %v329_v47 }
  0x26   : > { %v832_v33 = vmax.f32 %v243_v26, %v244_v29  ;;  %v334_v51 = vrot.slane %v333_v49, 4 }
  0x27   : > { %v834_v34 = vmax.f32 %v251_v27, %v252_v31  ;;  %v342_v53 = vrot.slane %v341_v50, 4 }
  0x28   : > { %v254_v35 = vsub.f32 %v229_v2, %v832_v33  ;;  %v256_v36 = vsub.f32 %v231_v4, %v832_v33  ;;  %v335_v62 = vadd.f32 %v334_v51, %v333_v49 }
  0x29   : > { %v255_v37 = vsub.f32 %v230_v3, %v834_v34  ;;  %v257_v38 = vsub.f32 %v232_v5, %v834_v34  ;;  %v343_v2 = vadd.f32 %v342_v53, %v341_v50 }
  0x2a   : > { %v258_v39 = vmul.f32 1.442695, %v254_v35  ;;  %v262_v40 = vmul.f32 1.442695, %v256_v36  ;;  %v336_v12 = vrot.slane %v335_v62, 2 }
  0x2b   : > { %v260_v41 = vmul.f32 1.442695, %v255_v37  ;;  %v264_v42 = vmul.f32 1.442695, %v257_v38  ;;  %v344_v13 = vrot.slane %v343_v2, 2 }
  0x2c   : > { %650 = vpow2.f32 %v258_v39  ;;  %v337_v26 = vadd.f32 %v336_v12, %v335_v62  ;;  %v752_v37 = vmov 1966171168  }
  0x2d   : > { %652 = vpow2.f32 %v260_v41  ;;  %v345_v27 = vadd.f32 %v344_v13, %v343_v2  ;;  %v353_v38 = vunpack.c.l.s4 %v752_v37 }
  0x2e   : > { %654 = vpow2.f32 %v262_v40  ;;  %v338_v35 = vrot.slane %v337_v26, 1 }
  0x2f   : > { %656 = vpow2.f32 %v264_v42  ;;  %v346_v36 = vrot.slane %v345_v27, 1  ;;  %v354_v42 = vunpack.c.0.s8 %v353_v38 }
  0x30   : > { %v339_v40 = vadd.f32 %v338_v35, %v337_v26 }
  0x31   : > { %v347_v41 = vadd.f32 %v346_v36, %v345_v27  ;;  %v357_v44 = vsub.s32 %v354_v42, %v817_v18 }
  0x33   : > { %v369_v45 = vcombine.low %v339_v40, %v347_v41 }
  0x36   : > { %v651_v52 = vpop.eup %650 }
  0x37   : > { %v653_v54 = vpop.eup %652  ;;  %v284_v55 = vsel %vm282_vm8, %v651_v52, 0.0 }
  0x38   : > { %v655_v56 = vpop.eup %654  ;;  %v285_v57 = vsel %vm282_vm8, %v653_v54, 0.0  ;;  %v290_v58 = vrot.slane %v284_v55, 4 }
  0x39   : > { %v657_v59 = vpop.eup %656  ;;  %v266_v60 = vsel %vm237_vm1, %v655_v56, 0.0  ;;  %v298_v61 = vrot.slane %v285_v57, 4 }
  0x3a   : > { %v267_v63 = vadd.f32 %v651_v52, %v266_v60  ;;  %v274_v0 = vsel %vm237_vm1, %v657_v59, 0.0  ;;  %v291_v1 = vadd.f32 %v290_v58, %v284_v55  ;;  %v376_v52 = vrot.slane %v369_v45, %v357_v44 }
  0x3b   : > { %v275_v3 = vadd.f32 %v653_v54, %v274_v0  ;;  %v299_v4 = vadd.f32 %v298_v61, %v285_v57 }
  0x3c   : > { %v268_v5 = vrot.slane %v267_v63, 4  ;;  %v292_v6 = vrot.slane %v291_v1, 2  ;;  %v383_v58 = vrot.slane %v376_v52, %v357_v44 }
  0x3d   : > { %v276_v8 = vrot.slane %v275_v3, 4  ;;  %v300_v9 = vrot.slane %v299_v4, 2 }
  0x3e   : > { %v269_v10 = vadd.f32 %v268_v5, %v267_v63  ;;  %v293_v11 = vadd.f32 %v292_v6, %v291_v1 }
  0x3f   : > { %v277_v14 = vadd.f32 %v276_v8, %v275_v3  ;;  %v301_v16 = vadd.f32 %v300_v9, %v299_v4  ;;  %v387_v4 = vld [vmem:[#allocation2] sm:$0x3] }
  0x40   : > { %v270_v17 = vrot.slane %v269_v10, 2  ;;  %v294_v19 = vrot.slane %v293_v11, 1 }
  0x41   : > { %v278_v20 = vrot.slane %v277_v14, 2  ;;  %v302_v21 = vrot.slane %v301_v16, 1 }
  0x42   : > { %v271_v22 = vadd.f32 %v270_v17, %v269_v10  ;;  %v295_v24 = vadd.f32 %v294_v19, %v293_v11 }
  0x43   : > { %v279_v28 = vadd.f32 %v278_v20, %v277_v14  ;;  %v303_v29 = vadd.f32 %v302_v21, %v301_v16 }
  0x44   : > { %v272_v30 = vrot.slane %v271_v22, 1  ;;  %658 = vlog2.f32 %v295_v24 }
  0x45   : > { %v280_v31 = vrot.slane %v279_v28, 1  ;;  %660 = vlog2.f32 %v303_v29 }
  0x46   : > { %v273_v32 = vadd.f32 %v272_v30, %v271_v22 }
  0x47   : > { %v281_v39 = vadd.f32 %v280_v31, %v279_v28 }
  0x48   : > { %662 = vlog2.f32 %v273_v32 }
  0x49   : > { %664 = vlog2.f32 %v281_v39 }
  0x4e   : > { %v659_v43 = vpop.eup %658 }
  0x4f   : > { %v661_v46 = vpop.eup %660  ;;  %v311_v47 = vmul.f32 0.6931472, %v659_v43 }
  0x50   : > { %v313_v48 = vmul.f32 0.6931472, %v661_v46 }
  0x51   : > { %v314_v49 = vadd.f32 %v311_v47, %v832_v33 }
  0x52   : > { %v663_v50 = vpop.eup %662  ;;  %v315_v51 = vadd.f32 %v313_v48, %v834_v34 }
  0x53   : > { %v665_v53 = vpop.eup %664  ;;  %v305_v55 = vmul.f32 0.6931472, %v663_v50 }
  0x54   : > { %v351_v54 = vcombine.low %v314_v49, %v315_v51  ;;  %v307_v56 = vmul.f32 0.6931472, %v665_v53 }
  0x55   : > { %v308_v18 = vadd.f32 %v305_v55, %v832_v33 }
  0x56   : > { %v358_v57 = vrot.slane %v351_v54, %v357_v44  ;;  %v309_v60 = vadd.f32 %v307_v56, %v834_v34  ;;  %v463_v34 = vld [vmem:[#allocation3] sm:$0x3] (%p430_p6) }
  0x57   : > { %v468_v11 = vrot.slane (%p430_p6), %v463_v34, %v820_v23  ;;  %v472_v12 = vrot.slane (%p430_p6), %v463_v34, %v825_v25 }
  0x58   : > { %v365_v59 = vrot.slane %v358_v57, %v357_v44 }
  0x59   : > { %v475_v14 = vsel (%p430_p6), %vm447_vm10, %v468_v11, 0.0  ;;  %v476_v16 = vsel (%p430_p6), %vm447_vm10, %v472_v12, 0.0 }
  0x5a   : > { %v385_v61 = vsel %vm348_vm9, %v365_v59, %v383_v58  ;;  %v477_v17 = vadd.f32 (%p430_p6), %v476_v16, %v475_v14 }
  0x5b   : > { %v392_v62 = vrot.slane %v385_v61, %v820_v23  ;;  %v396_v63 = vrot.slane %v385_v61, %v825_v25 }
  0x5d   : > { %v399_v0 = vsub.f32 %v308_v18, %v392_v62  ;;  %v400_v1 = vsub.f32 %v309_v60, %v396_v63 }
  0x5f   : > { %v403_v2 = vcombine.low %v399_v0, %v400_v1 }
  0x61   : > { %v410_v3 = vrot.slane %v403_v2, %v357_v44 }
  0x62   : > { %434 = sbr.rel (!%p430_p6) target bundleno = 327 (0x147), region = 36 }
  0x63   : > { %v417_v5 = vrot.slane %v410_v3, %v357_v44 }
  0x65   : > { %v419_v6 = vsel %vm386_vm2, %v417_v5, 0.0 }
  0x66   : > { %v420_v8 = vadd.f32 %v419_v6, %v387_v4 }
  0x68   : > { %425 = vst.msk [vmem:[#allocation2] sm:$0x3] %vm811_vm3, %v420_v8 }
  0x6f   : > { %v435_v33 = vld [vmem:[#allocation2] sm:$0x3] }
  0x70   : > { %v440_v9 = vrot.slane %v435_v33, %v820_v23  ;;  %v444_v10 = vrot.slane %v435_v33, %v825_v25 }
  0x72   : > { %v448_v7 = vsel %vm447_vm10, %v440_v9, 0.0  ;;  %v449_v13 = vsel %vm447_vm10, %v444_v10, 0.0 }
  0x73   : > { %v450_v15 = vadd.f32 %v449_v13, %v448_v7 }
  0x75   : > { %451 = vadd.xlane.f32.xlu0 %v450_v15 }
  0x79   : > { %478 = vadd.xlane.f32.xlu0 %v477_v17 }
 0x102   : > { %v452_v19 = vpop.xlane.xlu0 %451 }
 0x103   : > { %v453_v20 = vrot.slane %v452_v19, 4 }
 0x105   : > { %v454_v21 = vadd.f32 %v453_v20, %v452_v19 }
 0x106   : > { %v479_v22 = vpop.xlane.xlu0 %478 }
 0x107   : > { %v455_v24 = vrot.slane %v454_v21, 2  ;;  %v480_v26 = vrot.slane %v479_v22, 4 }
 0x109   : > { %v481_v27 = vadd.f32 %v480_v26, %v479_v22  ;;  %v456_v28 = vadd.f32 %v455_v24, %v454_v21 }
 0x10b   : > { %v482_v29 = vrot.slane %v481_v27, 2  ;;  %v457_v23 = vrot.slane %v456_v28, 1 }
 0x10d   : > { %v483_v30 = vadd.f32 %v482_v29, %v481_v27  ;;  %v458_v25 = vadd.f32 %v457_v23, %v456_v28 }
 0x10f   : > { %605 = vpush %v458_v25  ;;  %v484_v31 = vrot.slane %v483_v30, 1 }
 0x111   : > { %v485_v32 = vadd.f32 %v484_v31, %v483_v30 }
 0x113   : > { %607 = vpush %v485_v32 }
 0x140   : > { %s606_s26 = spop %605 }
 0x141   : > { %v460_v35 = vstv %s606_s26 }
 0x142   : > { %462 = vst.msk [vmem:[#allocation4] sm:$0x1] %vm461_vm11, %v460_v35 }
 0x144   : > { %s608_s27 = spop %607 }
 0x145   : > { %v487_v36 = vstv %s608_s27 }
 0x146   : > { %488 = vst.msk [vmem:[#allocation6] sm:$0x1] %vm461_vm11, %v487_v36 }
 0x147 PF: > { %p867_p7 = scmp.eq.s32.totalorder %s587_s15, 1  ;;  %s753_s29 = smov [#allocation4]  }
 0x148   : > { %s496_s30 = sshll.u32 %s753_s29, 4  ;;  %s754_s4 = smov [#allocation6]   ;;  %s497_s30 = int_to_ptr.vmem [resolvable:$true] %s496_s30 }
 0x149   : > { %s507_s5 = sshll.u32 %s754_s4, 4  ;;  %s666_s6 = scalar_lea.vmem %s497_s30, 16  ;;  %s871_s5 = int_to_ptr.vmem [resolvable:$true] %s507_s5 }
 0x14a   : > { %p667_p8 = scmp.ne.s32.totalorder %s497_s30, %s666_s6  ;;  %s672_s7 = scalar_lea.vmem %s497_s30, 32 }
 0x14b   : > { %p673_p11 = scmp.lt.s32.totalorder %s497_s30, %s497_s30  ;;  %p674_p12 = scmp.lt.s32.totalorder %s672_s7, %s666_s6 }
 0x14c   : > { %p668_p9 = pnand %p667_p8, %p867_p7 }
 0x14d   : > { %p675_p13 = por %p674_p12, %p673_p11 }
 0x14e   : > { %p669_p10 = pneg %p668_p9 }
 0x150   : > { %p676_p0 = pnand %p675_p13, %p669_p10 }
 0x152   : > { %679 = shalt.err (!%p676_p0)
}
 0x153   : > { %s680_s10 = scalar_lea.hbm %s934_s2, 16 }
 0x154   : > { %p681_p1 = scmp.ne.s32.totalorder %s934_s2, %s680_s10  ;;  %p686_p4 = scmp.lt.u32.totalorder %s680_s10, %s934_s2 }
 0x156   : > { %p682_p2 = pnand %p681_p1, %p867_p7 }
 0x158   : > { %p683_p3 = pneg %p682_p2 }
 0x15a   : > { %p688_p5 = pnand %p686_p4, %p683_p3 }
 0x15c   : > { %691 = shalt.err (!%p688_p5)
}
 0x15d   : > { %610 = dma.vmem_to_hbm [thread:$0]  (%p867_p7), %s497_s30, 16, %s934_s2, [#allocation5]  }
 0x15e   : > { %s692_s20 = scalar_lea.vmem %s871_s5, 16  ;;  %s698_s21 = scalar_lea.vmem %s871_s5, 32 }
 0x15f   : > { %p693_p6 = scmp.ne.s32.totalorder %s871_s5, %s692_s20  ;;  %p699_p10 = scmp.lt.s32.totalorder %s871_s5, %s871_s5 }
 0x160   : > { %p700_p11 = scmp.lt.s32.totalorder %s698_s21, %s692_s20 }
 0x161   : > { %p694_p8 = pnand %p693_p6, %p867_p7 }
 0x162   : > { %p701_p12 = por %p700_p11, %p699_p10 }
 0x163   : > { %p695_p9 = pneg %p694_p8 }
 0x165   : > { %p702_p13 = pnand %p701_p12, %p695_p9 }
 0x167   : > { %705 = shalt.err (!%p702_p13)
}
 0x168   : > { %s706_s24 = scalar_lea.hbm %s935_s3, 16 }
 0x169   : > { %p707_p0 = scmp.ne.s32.totalorder %s935_s3, %s706_s24  ;;  %p712_p3 = scmp.lt.u32.totalorder %s706_s24, %s935_s3 }
 0x16b   : > { %p708_p1 = pnand %p707_p0, %p867_p7 }
 0x16d   : > { %p709_p2 = pneg %p708_p1 }
 0x16f   : > { %p714_p4 = pnand %p712_p3, %p709_p2 }
 0x171   : > { %717 = shalt.err (!%p714_p4)
}
 0x172   : > { %612 = dma.vmem_to_hbm [thread:$0]  (%p867_p7), %s871_s5, 16, %s935_s3, [#allocation7]  }
 0x173   : > { %731 = dma.done.wait (%p867_p7), [#allocation5], 16  }
 0x174   : > { %733 = vsyncadd (%p867_p7), [#allocation5], 4294967280 }
 0x175   : > { %735 = dma.done.wait (%p867_p7), [#allocation7], 16  }
 0x176   : > { %737 = vsyncadd (%p867_p7), [#allocation7], 4294967280 }
 0x177 PF: > { %s16_s14 = sadd.s32 1, %s748_s14   ;;  %s939_s12 = smov %s744_s13 }
 0x178   : > { %p13_p5 = scmp.ge.s32.totalorder %s16_s14, 4   ;;  %s940_s13 = smov %s942_s16 }
 0x17a   :  { %15 = sbr.rel (!%p13_p5) target bundleno = 3 (0x3), region = 74 }
 0x181   :  { %524 = vsyncpa [#allocation5], 1 }
 0x182   :  { %526 = vsyncpa [#allocation5 + $0x1], 1 }
 0x183   :  { %527 = vsyncpa [#allocation7], 1 }

</bundles_post_ra>
